<compile_context>
chip_gen: v6e
topology: v6e:2x2x1
jax: 0.10.0
libtpu: 0.0.40
codegen_flags: <defaults>
</compile_context>

<pallas_src>
import functools

import jax
import jax.numpy as jnp
from jax.experimental import pallas as pl
from jax.experimental.pallas import tpu as pltpu

K = 4        # kernel_size
STRIDE = 2
PAD = 1
EPS = 1e-5   # nn.BatchNorm2d default eps
P = STRIDE * STRIDE   # 4 output parities (ph, pw)


def _fused_convT_bn_relu_kernel(cols_ref, w_ref, gamma_ref, beta_ref, out_ref):
    """One MXU matmul fused with training-mode BatchNorm + ReLU.

    cols_ref : (Kdim_pad, M)      bf16  im2col of the 1-padded input, M = N*H*W on lanes
    w_ref    : (P*Cout, Kdim_pad) bf16  4 parity weight slices stacked along rows
    gamma/beta: (Cout, 1)         f32
    out_ref  : (P*Cout, M)              rows grouped as (parity, Cout)
    """
    # (P*Cout, Kdim) @ (Kdim, M) -> (P*Cout, M), f32 accumulation on the MXU.
    y = jnp.dot(w_ref[...], cols_ref[...], preferred_element_type=jnp.float32)

    cout = gamma_ref.shape[0]
    p_cout, m = y.shape
    p = p_cout // cout
    inv_count = 1.0 / float(p * m)          # = 1 / (N*OH*OW)

    # Training-mode BN statistics per channel over all N*OH*OW positions:
    # one XLU lane-reduce each for sum and sum-of-squares over the full slab, then fold
    # the P parity row-groups with a sublane reshape + axis-0 add.
    s = jnp.sum(y, axis=1, keepdims=True).reshape(p, cout, 1)        # (P, Cout, 1)
    ss = jnp.sum(y * y, axis=1, keepdims=True).reshape(p, cout, 1)
    s = jnp.sum(s, axis=0)                                           # (Cout, 1)
    ss = jnp.sum(ss, axis=0)
    mean = s * inv_count
    var = ss * inv_count - mean * mean      # biased batch variance (as PyTorch training BN)

    # Fold BN into a per-channel scale/shift.  (The ConvTranspose bias is cancelled
    # exactly by training-mode BN, so it is never applied.)
    scale = gamma_ref[...] * jax.lax.rsqrt(var + EPS)                # (Cout, 1)
    shift = beta_ref[...] - mean * scale                             # (Cout, 1)

    # One FMA-style f32 pass + ReLU via a (P, Cout, M) view and (1, Cout, 1) broadcast;
    # full-lane unmasked store.
    y3 = y.reshape(p, cout, m)
    out = jnp.maximum(y3 * scale[None, :, :] + shift[None, :, :], 0.0)
    out_ref[...] = out.reshape(p_cout, m).astype(out_ref.dtype)
    # TODO(synk): BatchNorm2d running_mean/running_var bookkeeping (a training-time side
    # effect, not part of the returned tensor) is not reproduced.


@functools.partial(jax.jit, static_argnames=("out_dtype",))
def pyramid_convT2d(x, weight, bias, gamma, beta, *, out_dtype=jnp.float32):
    """x: (N, Cin, H, W); weight: (Cin, Cout, 4, 4) as in nn.ConvTranspose2d.

    Returns ReLU(BatchNorm2d(ConvTranspose2d(x))) in NCHW, shape (N, Cout, 2H, 2W).
    `bias` is accepted for API fidelity but unused: a conv bias immediately followed by
    training-mode BatchNorm is cancelled exactly (the batch mean absorbs it; variance is
    unaffected).
    """
    del bias
    N, Cin, H, W = x.shape
    Cout = weight.shape[1]
    OH, OW = STRIDE * H, STRIDE * W
    M = N * H * W
    Kdim = Cin * 3 * 3                       # shared 3x3 tap window over the 1-padded input
    kdim_pad = ((Kdim + 15) // 16) * 16      # bf16 sublane multiple -> clean MXU tiles

    # --- glue: sub-pixel decomposition of ConvT(k=4, s=2, p=1).
    # Output position (2*qh+ph, 2*qw+pw) = sum over dh,dw in {0,1} of
    #   xp[qh+ph+dh, qw+pw+dw] * W[:, :, 3-ph-2*dh, 3-pw-2*dw]
    # with xp = x padded by 1.  All 4 parities read the same 3x3 window, so one im2col of
    # depth Cin*9 feeds one matmul with P*Cout output rows (no structural zeros).
    xp = jnp.pad(x, ((0, 0), (0, 0), (1, 1), (1, 1))).astype(jnp.bfloat16)
    patches = jnp.stack(
        [xp[:, :, eh:eh + H, ew:ew + W] for eh in range(3) for ew in range(3)],
        axis=2)                                                      # (N, Cin, 9, H, W)
    cols_t = patches.transpose(1, 2, 0, 3, 4).reshape(Kdim, M)       # lane-dense (Kdim, M)
    cols_t = jnp.pad(cols_t, ((0, kdim_pad - Kdim), (0, 0)))         # zero rows: free in dot

    # Parity weight slices, each scattered into the shared 3x3 tap grid.
    wt = jnp.transpose(weight, (1, 0, 2, 3))                         # (Cout, Cin, 4, 4)
    parts = []
    for ph in range(STRIDE):
        for pw in range(STRIDE):
            sub = wt[:, :, 3 - ph::-2, 3 - pw::-2]                   # (Cout, Cin, 2, 2)
            parts.append(jnp.pad(sub, ((0, 0), (0, 0), (ph, 1 - ph), (pw, 1 - pw))))
    w_mat = jnp.stack(parts, axis=0).reshape(P * Cout, Kdim).astype(jnp.bfloat16)
    w_mat = jnp.pad(w_mat, ((0, 0), (0, kdim_pad - Kdim)))

    out_bytes = P * Cout * M * jnp.dtype(out_dtype).itemsize
    cost = pl.CostEstimate(
        flops=2 * P * Cout * kdim_pad * M,
        transcendentals=0,
        bytes_accessed=cols_t.size * 2 + w_mat.size * 2 + 2 * Cout * 4 + out_bytes)

    out = pl.pallas_call(
        _fused_convT_bn_relu_kernel,
        out_shape=jax.ShapeDtypeStruct((P * Cout, M), out_dtype),
        grid=(1,),   # single block: BN needs global batch stats; problem < 200 KiB VMEM
        in_specs=[
            pl.BlockSpec((kdim_pad, M), lambda i: (0, 0)),
            pl.BlockSpec((P * Cout, kdim_pad), lambda i: (0, 0)),
            pl.BlockSpec((Cout, 1), lambda i: (0, 0)),
            pl.BlockSpec((Cout, 1), lambda i: (0, 0)),
        ],
        out_specs=pl.BlockSpec((P * Cout, M), lambda i: (0, 0)),
        compiler_params=pltpu.CompilerParams(dimension_semantics=("arbitrary",)),
        cost_estimate=cost,
    )(cols_t, w_mat, gamma.reshape(Cout, 1), beta.reshape(Cout, 1))

    # Interleave the 4 parities back into NCHW:
    # (ph, pw, co, n, qh, qw) -> out[n, co, 2*qh+ph, 2*qw+pw]
    out = out.reshape(STRIDE, STRIDE, Cout, N, H, W).transpose(3, 2, 4, 0, 5, 1)
    return out.reshape(N, Cout, OH, OW)
    # TODO(synk): a scaling path for large N*H*W (tile M along a grid axis with two-phase
    # BN stats, megacore-parallel on v7x) is unnecessary at these shapes and is left out.


def _reference(x, weight, bias, gamma, beta):
    """Pure-JAX f32 reference (ConvTranspose2d + train-mode BN + ReLU)."""
    w = jnp.flip(weight, axis=(2, 3)).transpose(1, 0, 2, 3)          # (Cout, Cin, 4, 4)
    y = jax.lax.conv_general_dilated(
        x, w, window_strides=(1, 1),
        padding=((K - 1 - PAD,) * 2, (K - 1 - PAD,) * 2),
        lhs_dilation=(STRIDE, STRIDE),
        dimension_numbers=('NCHW', 'OIHW', 'NCHW'))
    y = y + bias[None, :, None, None]
    mean = y.mean(axis=(0, 2, 3), keepdims=True)
    var = ((y - mean) ** 2).mean(axis=(0, 2, 3), keepdims=True)
    y = (y - mean) * jax.lax.rsqrt(var + EPS)
    y = y * gamma[None, :, None, None] + beta[None, :, None, None]
    return jnp.maximum(y, 0.0)


if __name__ == "__main__":
    N, Cin, H, W = 2, 4, 16, 16
    Cout = 8

    key = jax.random.PRNGKey(0)
    k_x, k_w, k_b = jax.random.split(key, 3)

    x = jax.random.normal(k_x, (N, Cin, H, W), jnp.float32)
    # Deterministic synthetic parameters (shapes per nn.ConvTranspose2d / nn.BatchNorm2d).
    wscale = 1.0 / float(Cin * K * K) ** 0.5
    weight = jax.random.uniform(k_w, (Cin, Cout, K, K), jnp.float32, -wscale, wscale)
    bias = jax.random.uniform(k_b, (Cout,), jnp.float32, -wscale, wscale)
    gamma = jnp.ones((Cout,), jnp.float32)    # BatchNorm2d default weight init
    beta = jnp.zeros((Cout,), jnp.float32)    # BatchNorm2d default bias init

    out = jax.block_until_ready(pyramid_convT2d(x, weight, bias, gamma, beta))
    assert out.shape == (N, Cout, STRIDE * H, STRIDE * W), out.shape

    ref = _reference(x, weight, bias, gamma, beta)
    # bf16 MXU inputs (f32 accumulation) -> tolerance loosened vs. pure-f32.
    err = float(jnp.max(jnp.abs(out - ref)))
    assert jnp.allclose(out, ref, atol=3e-2, rtol=3e-2), err

    print("KERNEL_OK")
</pallas_src>

<mosaic_0001>
module attributes {stable_mosaic.version = 11 : i64} {
  func.func @_fused_convT_bn_relu_kernel(%arg0: i32, %arg1: memref<48x512xbf16, #tpu.memory_space<vmem>>, %arg2: memref<32x48xbf16, #tpu.memory_space<vmem>>, %arg3: memref<8x1xf32, #tpu.memory_space<vmem>>, %arg4: memref<8x1xf32, #tpu.memory_space<vmem>>, %arg5: memref<32x512xf32, #tpu.memory_space<vmem>>) attributes {dimension_semantics = [#tpu.dimension_semantics<arbitrary>], iteration_bounds = array<i64: 1>, scalar_prefetch = 0 : i64, scratch_operands = 0 : i64, tpu.core_type = #tpu.core_type<tc>, window_params = [{pipeline_mode = #tpu.pipeline_mode<synchronous>, transform_indices = @transform_0, window_bounds = array<i64: 48, 512>}, {pipeline_mode = #tpu.pipeline_mode<synchronous>, transform_indices = @transform_1, window_bounds = array<i64: 32, 48>}, {pipeline_mode = #tpu.pipeline_mode<synchronous>, transform_indices = @transform_2, window_bounds = array<i64: 8, 1>}, {pipeline_mode = #tpu.pipeline_mode<synchronous>, transform_indices = @transform_3, window_bounds = array<i64: 8, 1>}, {pipeline_mode = #tpu.pipeline_mode<synchronous>, transform_indices = @transform_4, window_bounds = array<i64: 32, 512>}]} {
    %c0 = arith.constant 0 : index
    %c0_0 = arith.constant 0 : index
    %0 = vector.load %arg2[%c0, %c0_0] : memref<32x48xbf16, #tpu.memory_space<vmem>>, vector<32x48xbf16>
    %c0_1 = arith.constant 0 : index
    %c0_2 = arith.constant 0 : index
    %1 = vector.load %arg1[%c0_1, %c0_2] : memref<48x512xbf16, #tpu.memory_space<vmem>>, vector<48x512xbf16>
    %cst = arith.constant dense<0.000000e+00> : vector<32x512xf32>
    %2 = tpu.matmul %0, %1, %cst {dimension_numbers = #tpu.dot_dimension_numbers<[1], [0], [0], [1], [0, 0, 1, 1], [], []>} : vector<32x48xbf16>, vector<48x512xbf16>, vector<32x512xf32> -> vector<32x512xf32>
    %cst_3 = arith.constant dense<0.000000e+00> : vector<32xf32>
    %3 = vector.multi_reduction <add>, %2, %cst_3 [1] : vector<32x512xf32> to vector<32xf32>
    %4 = vector.shape_cast %3 : vector<32xf32> to vector<32x1xf32>
    %5 = vector.shape_cast %4 : vector<32x1xf32> to vector<4x8x1xf32>
    %6 = arith.mulf %2, %2 : vector<32x512xf32>
    %cst_4 = arith.constant dense<0.000000e+00> : vector<32xf32>
    %7 = vector.multi_reduction <add>, %6, %cst_4 [1] : vector<32x512xf32> to vector<32xf32>
    %8 = vector.shape_cast %7 : vector<32xf32> to vector<32x1xf32>
    %9 = vector.shape_cast %8 : vector<32x1xf32> to vector<4x8x1xf32>
    %cst_5 = arith.constant dense<0.000000e+00> : vector<8x1xf32>
    %10 = vector.multi_reduction <add>, %5, %cst_5 [0] : vector<4x8x1xf32> to vector<8x1xf32>
    %cst_6 = arith.constant dense<0.000000e+00> : vector<8x1xf32>
    %11 = vector.multi_reduction <add>, %9, %cst_6 [0] : vector<4x8x1xf32> to vector<8x1xf32>
    %cst_7 = arith.constant 4.8828125E-4 : f32
    %12 = vector.broadcast %cst_7 : f32 to vector<8x1xf32>
    %13 = arith.mulf %10, %12 : vector<8x1xf32>
    %cst_8 = arith.constant 4.8828125E-4 : f32
    %14 = vector.broadcast %cst_8 : f32 to vector<8x1xf32>
    %15 = arith.mulf %11, %14 : vector<8x1xf32>
    %16 = arith.mulf %13, %13 : vector<8x1xf32>
    %17 = arith.subf %15, %16 : vector<8x1xf32>
    %c0_9 = arith.constant 0 : index
    %c0_10 = arith.constant 0 : index
    %18 = vector.load %arg3[%c0_9, %c0_10] : memref<8x1xf32, #tpu.memory_space<vmem>>, vector<8x1xf32>
    %cst_11 = arith.constant 9.99999974E-6 : f32
    %19 = vector.broadcast %cst_11 : f32 to vector<8x1xf32>
    %20 = arith.addf %17, %19 : vector<8x1xf32>
    %21 = math.rsqrt %20 : vector<8x1xf32>
    %22 = arith.mulf %18, %21 : vector<8x1xf32>
    %c0_12 = arith.constant 0 : index
    %c0_13 = arith.constant 0 : index
    %23 = vector.load %arg4[%c0_12, %c0_13] : memref<8x1xf32, #tpu.memory_space<vmem>>, vector<8x1xf32>
    %24 = arith.mulf %13, %22 : vector<8x1xf32>
    %25 = arith.subf %23, %24 : vector<8x1xf32>
    %26 = vector.shape_cast %2 : vector<32x512xf32> to vector<4x8x512xf32>
    %27 = vector.shape_cast %22 : vector<8x1xf32> to vector<1x8x1xf32>
    %28 = vector.broadcast %27 : vector<1x8x1xf32> to vector<4x8x512xf32>
    %29 = arith.mulf %26, %28 : vector<4x8x512xf32>
    %30 = vector.shape_cast %25 : vector<8x1xf32> to vector<1x8x1xf32>
    %31 = vector.broadcast %30 : vector<1x8x1xf32> to vector<4x8x512xf32>
    %32 = arith.addf %29, %31 : vector<4x8x512xf32>
    %cst_14 = arith.constant 0.000000e+00 : f32
    %33 = vector.broadcast %cst_14 : f32 to vector<4x8x512xf32>
    %34 = arith.maximumf %32, %33 : vector<4x8x512xf32>
    %35 = vector.shape_cast %34 : vector<4x8x512xf32> to vector<32x512xf32>
    %c0_15 = arith.constant 0 : index
    %c0_16 = arith.constant 0 : index
    %36 = vector.load %arg5[%c0_15, %c0_16] : memref<32x512xf32, #tpu.memory_space<vmem>>, vector<32x512xf32>
    tpu.vector_store %arg5[%c0_15, %c0_16], %35 {strides = array<i32>} : memref<32x512xf32, #tpu.memory_space<vmem>>, vector<32x512xf32>,
    return
  }
  func.func @transform_0(%arg0: i32) -> (i32, i32) {
    %c0_i32 = arith.constant 0 : i32
    %c0_i32_0 = arith.constant 0 : i32
    %c0_i32_1 = arith.constant 0 : i32
    return %c0_i32, %c0_i32_0 : i32, i32
  }
  func.func @transform_1(%arg0: i32) -> (i32, i32) {
    %c0_i32 = arith.constant 0 : i32
    %c0_i32_0 = arith.constant 0 : i32
    %c0_i32_1 = arith.constant 0 : i32
    return %c0_i32, %c0_i32_0 : i32, i32
  }
  func.func @transform_2(%arg0: i32) -> (i32, i32) {
    %c0_i32 = arith.constant 0 : i32
    %c0_i32_0 = arith.constant 0 : i32
    %c0_i32_1 = arith.constant 0 : i32
    return %c0_i32, %c0_i32_0 : i32, i32
  }
  func.func @transform_3(%arg0: i32) -> (i32, i32) {
    %c0_i32 = arith.constant 0 : i32
    %c0_i32_0 = arith.constant 0 : i32
    %c0_i32_1 = arith.constant 0 : i32
    return %c0_i32, %c0_i32_0 : i32, i32
  }
  func.func @transform_4(%arg0: i32) -> (i32, i32) {
    %c0_i32 = arith.constant 0 : i32
    %c0_i32_0 = arith.constant 0 : i32
    %c0_i32_1 = arith.constant 0 : i32
    return %c0_i32, %c0_i32_0 : i32, i32
  }
}

</mosaic_0001>

<bundles_post_ra>
// kernel: pyramid_convT2d.1
= control target key start
LH: loop header
LB: loop body
LE: loop exit
PB: predicated region body
PF: predicated region fallthrough
CT: control target
= control target key end

     0   :  { %v411_v1 = vmov 0   ;;  %vm104_vm0 = vcmask 392192   ;;  %s623_s0 = inlined_call_operand.vmem [shape: bf16[48,512], index: 0, kind: input, shape index: {}]   ;;  %s624_s1 = inlined_call_operand.vmem [shape: bf16[32,48], index: 1, kind: input, shape index: {}]   ;;  %s625_s2 = inlined_call_operand.vmem [shape: f32[8,1], index: 2, kind: input, shape index: {}]   ;;  %s626_s3 = inlined_call_operand.vmem [shape: f32[8,1], index: 3, kind: input, shape index: {}]   ;;  %s627_s4 = inlined_call_operand.vmem [shape: f32[32,512], index: 4, kind: output, shape index: {}]  }
   0x1   :  { %v389_v0 = vld [vmem:[%s623_s0 + $0x44] ss:$16 sps:$4 sm:$0xff]   ;;  %143 = vmatprep.mubr.bf16.mxu0 %v411_v1  ;;  %196 = vmatprep.mubr.bf16.mxu1 %v411_v1  ;;  %v391_v2 = vld [vmem:[%s623_s0 + $0x4c] ss:$16 sps:$4 sm:$0xff]   ;;  %v393_v3 = vld [vmem:[%s623_s0 + $0x40] ss:$16 sps:$4 sm:$0xff]  }
   0x2   :  { %387 = vset.pattern.permute.xlu0 %v411_v1  ;;  %388 = vset.pattern.permute.xlu1 %v411_v1  ;;  %v394_v4 = vld [vmem:[%s623_s0 + $0x48] ss:$16 sps:$4 sm:$0xff]   ;;  %v395_v5 = vld [vmem:[%s623_s0 + $0x24] ss:$16 sps:$4 sm:$0xff]   ;;  %v397_v6 = vld [vmem:[%s623_s0 + $0x2c] ss:$16 sps:$4 sm:$0xff]  }
   0x3   :  { %121 = vmatprep.subr.bf16.mxu0 %v389_v0  ;;  %174 = vmatprep.subr.bf16.mxu1 %v391_v2  ;;  %v399_v7 = vld [vmem:[%s623_s0 + $0x20] ss:$16 sps:$4 sm:$0xff]   ;;  %v400_v8 = vld [vmem:[%s623_s0 + $0x28] ss:$16 sps:$4 sm:$0xff]   ;;  %v401_v9 = vld [vmem:[%s623_s0 + $0x4] ss:$16 sps:$4 sm:$0xff]  }
   0x4   :  { %122 = vmatpush1.bf16.msra.mxu0 %v393_v3  ;;  %175 = vmatpush1.bf16.msra.mxu1 %v394_v4  ;;  %v403_v10 = vld [vmem:[%s623_s0 + $0xc] ss:$16 sps:$4 sm:$0xff]   ;;  %v405_v11 = vld [vmem:[%s623_s0] ss:$16 sps:$4 sm:$0xff]   ;;  %v406_v12 = vld [vmem:[%s623_s0 + $0x8] ss:$16 sps:$4 sm:$0xff]  }
   0x5   :  { %123 = vmatprep.subr.bf16.mxu0 %v395_v5  ;;  %176 = vmatprep.subr.bf16.mxu1 %v397_v6  ;;  %v407_v13 = vld [vmem:[%s624_s1] sm:$0xff]   ;;  %v408_v14 = vld [vmem:[%s624_s1 + $0x8] sm:$0xff]  }
   0x8   :  { %124 = vmatpush1.bf16.msra.mxu0 %v399_v7  ;;  %177 = vmatpush1.bf16.msra.mxu1 %v400_v8 }
   0x9   :  { %125 = vmatprep.subr.bf16.mxu0 %v401_v9  ;;  %178 = vmatprep.subr.bf16.mxu1 %v403_v10 }
   0xc   :  { %126 = vmatpush1.bf16.msra.mxu0 %v405_v11  ;;  %179 = vmatpush1.bf16.msra.mxu1 %v406_v12 }
   0xf   :  { %382 = vmatmul.mubr.msk.bf16.vlgmr.msra.gmra.mxu0 %vm104_vm0, %v407_v13  ;;  %384 = vmatmul.mubr.msk.bf16.vlgmr.msra.gmra.mxu1 %vm104_vm0, %v407_v13 }
  0x10   :  { %153 = vmatprep.mubr.bf16.mxu0 %v411_v1  ;;  %206 = vmatprep.mubr.bf16.mxu1 %v411_v1 }
  0x17   :  { %383 = vmatmul.mubr.msk.bf16.gmra.mxu0 %vm104_vm0, %v408_v14  ;;  %385 = vmatmul.mubr.msk.bf16.gmra.mxu1 %vm104_vm0, %v408_v14 }
  0xcf   :  { %v479_v15 = vpop.f32.mrf.mxu0  ;;  %v481_v16 = vpop.f32.mrf.mxu1 }
  0xd0   :  { %v237_v19 = vmul.f32 %v479_v15, %v479_v15  ;;  %v239_v20 = vmul.f32 %v481_v16, %v481_v16 }
  0xd1   :  { %v483_v17 = vpop.f32.mrf.mxu0  ;;  %v485_v18 = vpop.f32.mrf.mxu1 }
  0xd2   :  { %v217_v21 = vadd.f32 %v483_v17, %v479_v15  ;;  %v238_v22 = vmul.f32 %v483_v17, %v483_v17  ;;  %v240_v29 = vmul.f32 %v485_v18, %v485_v18 }
  0xd3   :  { %v495_v23 = vpop.f32.mrf.mxu0  ;;  %v497_v24 = vpop.f32.mrf.mxu1 }
  0xd4   :  { %v218_v25 = vadd.f32 %v217_v21, %v481_v16  ;;  %v253_v26 = vadd.f32 %v238_v22, %v237_v19  ;;  %v241_v34 = vmul.f32 %v495_v23, %v495_v23  ;;  %v243_v39 = vmul.f32 %v497_v24, %v497_v24 }
  0xd5   :  { %v500_v27 = vpop.f32.mrf.mxu0  ;;  %v502_v28 = vpop.f32.mrf.mxu1 }
  0xd6   :  { %v222_v30 = vadd.f32 %v500_v27, %v495_v23  ;;  %v242_v31 = vmul.f32 %v500_v27, %v500_v27  ;;  %v219_v32 = vadd.f32 %v218_v25, %v485_v18  ;;  %v254_v33 = vadd.f32 %v253_v26, %v239_v20 }
  0xd7   :  { %v513_v35 = vpop.f32.mrf.mxu0  ;;  %v515_v36 = vpop.f32.mrf.mxu1  ;;  %v244_v50 = vmul.f32 %v502_v28, %v502_v28 }
  0xd8   :  { %220 = vadd.xlane.f32.xlu0 %v219_v32  ;;  %v255_v37 = vadd.f32 %v254_v33, %v240_v29  ;;  %v223_v38 = vadd.f32 %v222_v30, %v497_v24  ;;  %v258_v42 = vadd.f32 %v242_v31, %v241_v34  ;;  %v245_v43 = vmul.f32 %v513_v35, %v513_v35  ;;  %v283_v34 = vld [vmem:[%s625_s2] sm:$0xff] }
  0xd9   :  { %v520_v40 = vpop.f32.mrf.mxu0  ;;  %v522_v41 = vpop.f32.mrf.mxu1  ;;  %v247_v47 = vmul.f32 %v515_v36, %v515_v36 }
  0xda   :  { %v227_v44 = vadd.f32 %v520_v40, %v513_v35  ;;  %v246_v45 = vmul.f32 %v520_v40, %v520_v40  ;;  %256 = vadd.xlane.f32.xlu1 %v255_v37  ;;  %v224_v46 = vadd.f32 %v223_v38, %v502_v28  ;;  %v259_v49 = vadd.f32 %v258_v42, %v243_v39  ;;  %v287_v39 = vld [vmem:[%s626_s3] sm:$0xff] }
  0xdb   :  { %v533_v48 = vpop.f32.mrf.mxu0  ;;  %v540_v54 = vpop.f32.mrf.mxu1  ;;  %v248_v60 = vmul.f32 %v522_v41, %v522_v41 }
  0xdc   :  { %225 = vadd.xlane.f32.xlu0 %v224_v46  ;;  %v228_v51 = vadd.f32 %v227_v44, %v515_v36  ;;  %v263_v52 = vadd.f32 %v246_v45, %v245_v43  ;;  %v249_v53 = vmul.f32 %v533_v48, %v533_v48  ;;  %v260_v58 = vadd.f32 %v259_v49, %v244_v50 }
  0xdd   :  { %v542_v55 = vpop.f32.mrf.mxu0  ;;  %v251_v62 = vmul.f32 %v540_v54, %v540_v54  ;;  %v214_v1 = vpop.f32.mrf.mxu1 }
  0xde   :  { %v232_v56 = vadd.f32 %v542_v55, %v533_v48  ;;  %v250_v57 = vmul.f32 %v542_v55, %v542_v55  ;;  %v229_v59 = vadd.f32 %v228_v51, %v522_v41  ;;  %v264_v61 = vadd.f32 %v263_v52, %v247_v47 }
  0xdf   :  { %v252_v5 = vmul.f32 %v214_v1, %v214_v1 }
  0xe0   :  { %v268_v63 = vadd.f32 %v250_v57, %v249_v53  ;;  %261 = vadd.xlane.f32.xlu0 %v260_v58  ;;  %230 = vadd.xlane.f32.xlu1 %v229_v59  ;;  %v233_v0 = vadd.f32 %v232_v56, %v540_v54  ;;  %v265_v2 = vadd.f32 %v264_v61, %v248_v60 }
  0xe2   :  { %v234_v3 = vadd.f32 %v233_v0, %v214_v1  ;;  %v269_v4 = vadd.f32 %v268_v63, %v251_v62 }
  0xe4   :  { %266 = vadd.xlane.f32.xlu0 %v265_v2  ;;  %235 = vadd.xlane.f32.xlu1 %v234_v3  ;;  %v270_v6 = vadd.f32 %v269_v4, %v252_v5 }
  0xe8   :  { %271 = vadd.xlane.f32.xlu1 %v270_v6 }
 0x161   :  { %v221_v7 = vpop.xlane.xlu0 %220 }
 0x163   :  { %v257_v8 = vpop.xlane.xlu1 %256 }
 0x165   :  { %v226_v9 = vpop.xlane.xlu0 %225 }
 0x166   :  { %v273_v12 = vadd.f32 %v226_v9, %v221_v7 }
 0x169   :  { %v262_v10 = vpop.xlane.xlu0 %261  ;;  %v231_v11 = vpop.xlane.xlu1 %230 }
 0x16a   :  { %v274_v13 = vadd.f32 %v273_v12, %v231_v11  ;;  %v276_v20 = vadd.f32 %v262_v10, %v257_v8 }
 0x16d   :  { %v267_v14 = vpop.xlane.xlu0 %266  ;;  %v236_v19 = vpop.xlane.xlu1 %235 }
 0x16e   :  { %v275_v21 = vadd.f32 %v274_v13, %v236_v19  ;;  %v277_v22 = vadd.f32 %v276_v20, %v267_v14 }
 0x170   :  { %v279_v25 = vmul.f32 0.00048828125, %v275_v21 }
 0x171   :  { %v272_v26 = vpop.xlane.xlu1 %271 }
 0x172   :  { %v278_v29 = vadd.f32 %v277_v22, %v272_v26  ;;  %v281_v30 = vmul.f32 %v279_v25, %v279_v25 }
 0x174   :  { %v280_v31 = vmul.f32 0.00048828125, %v278_v29 }
 0x176   :  { %v282_v32 = vsub.f32 %v280_v31, %v281_v30 }
 0x178   :  { %v284_v33 = vadd.f32 1e-05, %v282_v32 }
 0x17a   :  { %409 = vrsqrt.f32 %v284_v33 }
 0x187   :  { %v410_v37 = vpop.eup %409 }
 0x188   :  { %v286_v38 = vmul.f32 %v410_v37, %v283_v34 }
 0x18a   :  { %292 = vperm.xlu0 %387, %v286_v38   ;;  %v288_v42 = vmul.f32 %v286_v38, %v279_v25 }
 0x18c   :  { %v289_v43 = vsub.f32 %v287_v39, %v288_v42 }
 0x18e   :  { %313 = vperm.xlu1 %388, %v289_v43  }
 0x205   :  { %v293_v44 = vpop.permute.xlu0 %292 }
 0x206   :  { %v295_v45 = vmul.f32 %v293_v44, %v479_v15  ;;  %v296_v46 = vmul.f32 %v293_v44, %v483_v17  ;;  %v297_v47 = vmul.f32 %v293_v44, %v481_v16  ;;  %v298_v49 = vmul.f32 %v293_v44, %v485_v18 }
 0x207   :  { %v299_v50 = vmul.f32 %v293_v44, %v495_v23  ;;  %v300_v51 = vmul.f32 %v293_v44, %v500_v27  ;;  %v301_v52 = vmul.f32 %v293_v44, %v497_v24  ;;  %v302_v53 = vmul.f32 %v293_v44, %v502_v28 }
 0x208   :  { %v303_v56 = vmul.f32 %v293_v44, %v513_v35  ;;  %v304_v57 = vmul.f32 %v293_v44, %v520_v40  ;;  %v305_v15 = vmul.f32 %v293_v44, %v515_v36  ;;  %v306_v17 = vmul.f32 %v293_v44, %v522_v41 }
 0x209   :  { %v307_v16 = vmul.f32 %v293_v44, %v533_v48  ;;  %v308_v18 = vmul.f32 %v293_v44, %v542_v55  ;;  %v309_v23 = vmul.f32 %v293_v44, %v540_v54  ;;  %v310_v58 = vmul.f32 %v293_v44, %v214_v1  ;;  %v314_v27 = vpop.permute.xlu1 %313 }
 0x20a   :  { %v316_v59 = vadd.f32 %v314_v27, %v295_v45  ;;  %v317_v24 = vadd.f32 %v314_v27, %v296_v46  ;;  %v318_v60 = vadd.f32 %v314_v27, %v297_v47  ;;  %v319_v28 = vadd.f32 %v314_v27, %v298_v49 }
 0x20b   :  { %v320_v61 = vadd.f32 %v314_v27, %v299_v50  ;;  %v321_v35 = vadd.f32 %v314_v27, %v300_v51  ;;  %v322_v62 = vadd.f32 %v314_v27, %v301_v52  ;;  %v323_v40 = vadd.f32 %v314_v27, %v302_v53 }
 0x20c   :  { %v324_v63 = vadd.f32 %v314_v27, %v303_v56  ;;  %v325_v36 = vadd.f32 %v314_v27, %v304_v57  ;;  %v326_v0 = vadd.f32 %v314_v27, %v305_v15  ;;  %v327_v41 = vadd.f32 %v314_v27, %v306_v17 }
 0x20d   :  { %v328_v2 = vadd.f32 %v314_v27, %v307_v16  ;;  %v329_v48 = vadd.f32 %v314_v27, %v308_v18  ;;  %v330_v3 = vadd.f32 %v314_v27, %v309_v23  ;;  %v331_v55 = vadd.f32 %v314_v27, %v310_v58 }
 0x20e   :  { %v332_v4 = vmax.f32 %v316_v59, 0.0  ;;  %v333_v54 = vmax.f32 %v317_v24, 0.0  ;;  %v334_v1 = vmax.f32 %v318_v60, 0.0  ;;  %v335_v5 = vmax.f32 %v319_v28, 0.0 }
 0x20f   :  { %v336_v6 = vmax.f32 %v320_v61, 0.0  ;;  %v337_v7 = vmax.f32 %v321_v35, 0.0  ;;  %v338_v8 = vmax.f32 %v322_v62, 0.0  ;;  %v339_v9 = vmax.f32 %v323_v40, 0.0 }
 0x210   :  { %v340_v10 = vmax.f32 %v324_v63, 0.0  ;;  %v341_v11 = vmax.f32 %v325_v36, 0.0  ;;  %v342_v12 = vmax.f32 %v326_v0, 0.0  ;;  %v343_v13 = vmax.f32 %v327_v41, 0.0  ;;  %348 = vst [vmem:[%s627_s4] sm:$0xff] %v332_v4  ;;  %349 = vst [vmem:[%s627_s4 + $0x8] sm:$0xff] %v333_v54 }
 0x211   :  { %350 = vst [vmem:[%s627_s4 + $0x10] sm:$0xff] %v334_v1  ;;  %351 = vst [vmem:[%s627_s4 + $0x18] sm:$0xff] %v335_v5  ;;  %v344_v14 = vmax.f32 %v328_v2, 0.0  ;;  %v345_v19 = vmax.f32 %v329_v48, 0.0  ;;  %v346_v20 = vmax.f32 %v330_v3, 0.0  ;;  %v347_v21 = vmax.f32 %v331_v55, 0.0 }
 0x212   :  { %352 = vst [vmem:[%s627_s4 + $0x20] sm:$0xff] %v336_v6  ;;  %353 = vst [vmem:[%s627_s4 + $0x28] sm:$0xff] %v337_v7 }
 0x213   :  { %354 = vst [vmem:[%s627_s4 + $0x30] sm:$0xff] %v338_v8  ;;  %355 = vst [vmem:[%s627_s4 + $0x38] sm:$0xff] %v339_v9 }
 0x214   :  { %356 = vst [vmem:[%s627_s4 + $0x40] sm:$0xff] %v340_v10  ;;  %357 = vst [vmem:[%s627_s4 + $0x48] sm:$0xff] %v341_v11 }
 0x215   :  { %358 = vst [vmem:[%s627_s4 + $0x50] sm:$0xff] %v342_v12  ;;  %359 = vst [vmem:[%s627_s4 + $0x58] sm:$0xff] %v343_v13 }
 0x216   :  { %360 = vst [vmem:[%s627_s4 + $0x60] sm:$0xff] %v344_v14  ;;  %361 = vst [vmem:[%s627_s4 + $0x68] sm:$0xff] %v345_v19 }
 0x217   :  { %362 = vst [vmem:[%s627_s4 + $0x70] sm:$0xff] %v346_v20  ;;  %363 = vst [vmem:[%s627_s4 + $0x78] sm:$0xff] %v347_v21 }

</bundles_post_ra>
